<compile_context>
chip_gen: v6e
topology: v6e:2x2x1
jax: 0.10.0
libtpu: 0.0.40
codegen_flags: <defaults>
</compile_context>

<pallas_src>
import functools

import jax
import jax.numpy as jnp
from jax.experimental import pallas as pl
from jax.experimental.pallas import tpu as pltpu

EPS = 1e-5
NUM_FEATURES = 100              # module spec: nn.BatchNorm1d(num_features=100)
SMALL_N_THRESHOLD = 16384       # whole-array single-read path up to here
ROW_TILE = 8192                 # (8192, 100->128 lanes) f32 tile = 4 MiB
_VMEM_LIMIT = 48 * 1024 * 1024  # > v5e's 16 MiB default, < v7x's 64 MiB physical


# ----------------------------- kernels ------------------------------------ #

def _bn_small_kernel(x_ref, o_ref):
    """Whole-array batch norm: stable centered variance, one HBM read of x."""
    x = x_ref[...].astype(jnp.float32)                          # (N, C)
    mean = jnp.mean(x, axis=0, keepdims=True)                   # (1, C)
    centered = x - mean
    var = jnp.mean(centered * centered, axis=0, keepdims=True)  # biased var
    o_ref[...] = (centered * jax.lax.rsqrt(var + EPS)).astype(o_ref.dtype)


def _bn_stats_kernel(x_ref, sum_ref, sq_ref, *, n_true, row_tile):
    """Pass 1: accumulate per-feature sum / sum-of-squares across row tiles."""
    i = pl.program_id(0)

    @pl.when(i == 0)
    def _init():
        sum_ref[...] = jnp.zeros_like(sum_ref)
        sq_ref[...] = jnp.zeros_like(sq_ref)

    x = x_ref[...].astype(jnp.float32)                          # (ROW_TILE, C)
    if n_true % row_tile != 0:
        # Ragged last tile: rows >= n_true hold unspecified data -> mask to 0.
        row = jax.lax.broadcasted_iota(jnp.int32, (row_tile, 1), 0) + i * row_tile
        x = jnp.where(row < n_true, x, 0.0)
    sum_ref[...] += jnp.sum(x, axis=0, keepdims=True)
    sq_ref[...] += jnp.sum(x * x, axis=0, keepdims=True)


def _bn_norm_kernel(x_ref, scale_ref, shift_ref, o_ref):
    """Pass 2: folded affine x * scale + shift, tile by tile."""
    x = x_ref[...].astype(jnp.float32)                          # (ROW_TILE, C)
    o_ref[...] = (x * scale_ref[...] + shift_ref[...]).astype(o_ref.dtype)


# ----------------------------- wrappers ------------------------------------ #

def _bn_small(x):
    n, c = x.shape
    return pl.pallas_call(
        _bn_small_kernel,
        out_shape=jax.ShapeDtypeStruct((n, c), x.dtype),
        in_specs=[pl.BlockSpec(memory_space=pltpu.MemorySpace.VMEM)],
        out_specs=pl.BlockSpec(memory_space=pltpu.MemorySpace.VMEM),
        input_output_aliases={0: 0},
        compiler_params=pltpu.CompilerParams(vmem_limit_bytes=_VMEM_LIMIT),
        cost_estimate=pl.CostEstimate(
            flops=4 * n * c, transcendentals=c, bytes_accessed=2 * n * c * 4),
    )(x)


def _bn_tiled(x):
    n, c = x.shape
    n_tiles = pl.cdiv(n, ROW_TILE)

    # Pass 1: per-feature sum / sum-of-squares (single HBM read of x).
    stats_kernel = functools.partial(_bn_stats_kernel, n_true=n, row_tile=ROW_TILE)
    sums, sqs = pl.pallas_call(
        stats_kernel,
        out_shape=(jax.ShapeDtypeStruct((1, c), jnp.float32),
                   jax.ShapeDtypeStruct((1, c), jnp.float32)),
        grid=(n_tiles,),
        in_specs=[pl.BlockSpec((ROW_TILE, c), lambda i: (i, 0))],
        out_specs=(pl.BlockSpec((1, c), lambda i: (0, 0)),
                   pl.BlockSpec((1, c), lambda i: (0, 0))),
        compiler_params=pltpu.CompilerParams(
            dimension_semantics=("arbitrary",),
            vmem_limit_bytes=_VMEM_LIMIT),
        cost_estimate=pl.CostEstimate(
            flops=4 * n * c, transcendentals=0,
            bytes_accessed=n * c * 4 + 2 * c * 4),
    )(x)

    # Tiny (1, C) stat math in plain XLA; fold into scale / shift.
    inv_n = jnp.float32(1.0 / float(n))
    mean = sums * inv_n
    var = jnp.maximum(sqs * inv_n - mean * mean, 0.0)   # clamp E[x^2]-mean^2
    scale = jax.lax.rsqrt(var + EPS)
    shift = -mean * scale

    # Pass 2: normalize; embarrassingly parallel over row tiles.  Out-of-bounds
    # rows in the ragged last tile are never written back (masked writeback).
    return pl.pallas_call(
        _bn_norm_kernel,
        out_shape=jax.ShapeDtypeStruct((n, c), x.dtype),
        grid=(n_tiles,),
        in_specs=[pl.BlockSpec((ROW_TILE, c), lambda i: (i, 0)),
                  pl.BlockSpec((1, c), lambda i: (0, 0)),
                  pl.BlockSpec((1, c), lambda i: (0, 0))],
        out_specs=pl.BlockSpec((ROW_TILE, c), lambda i: (i, 0)),
        compiler_params=pltpu.CompilerParams(
            dimension_semantics=("parallel",),
            vmem_limit_bytes=_VMEM_LIMIT),
        cost_estimate=pl.CostEstimate(
            flops=2 * n * c, transcendentals=0,
            bytes_accessed=2 * n * c * 4 + 2 * c * 4),
    )(x, scale, shift)


def batchnorm1d(x):
    """BatchNorm1d (training mode, affine=False) over (N, C) input."""
    n, _ = x.shape
    if n <= SMALL_N_THRESHOLD:
        return _bn_small(x)
    return _bn_tiled(x)


# ----------------------------- reference / test ---------------------------- #

def _reference(x):
    mean = jnp.mean(x, axis=0, keepdims=True)
    var = jnp.mean((x - mean) ** 2, axis=0, keepdims=True)   # biased variance
    return (x - mean) / jnp.sqrt(var + EPS)


if __name__ == "__main__":
    key = jax.random.PRNGKey(0)
    k0, k1 = jax.random.split(key)

    # Shipped module shape: BatchNorm1d(num_features=100) -> (N, 100).
    x_small = jax.random.normal(k0, (8, NUM_FEATURES), dtype=jnp.float32) * 2.0 + 0.5
    ref_small = jax.block_until_ready(_reference(x_small))
    out_small = jax.block_until_ready(batchnorm1d(x_small))
    assert jnp.allclose(out_small, ref_small, atol=1e-5, rtol=1e-5), \
        "small-path mismatch vs reference"

    # Exercise the tiled (large-N) path, including the ragged last row tile.
    x_big = jax.random.normal(k1, (16500, NUM_FEATURES), dtype=jnp.float32) * 1.5 - 0.25
    ref_big = jax.block_until_ready(_reference(x_big))
    out_big = jax.block_until_ready(batchnorm1d(x_big))
    assert jnp.allclose(out_big, ref_big, atol=2e-4, rtol=1e-4), \
        "tiled-path mismatch vs reference"

    print("KERNEL_OK")
</pallas_src>

<mosaic_0001>
module attributes {stable_mosaic.version = 11 : i64} {
  func.func @_bn_small_kernel(%arg0: memref<8x100xf32, #tpu.memory_space<vmem>>, %arg1: memref<8x100xf32, #tpu.memory_space<vmem>>) attributes {dimension_semantics = [], scalar_prefetch = 0 : i64, scratch_operands = 0 : i64, tpu.core_type = #tpu.core_type<tc>} {
    %c0 = arith.constant 0 : index
    %c0_0 = arith.constant 0 : index
    %0 = vector.load %arg0[%c0, %c0_0] : memref<8x100xf32, #tpu.memory_space<vmem>>, vector<8x100xf32>
    %cst = arith.constant dense<0.000000e+00> : vector<100xf32>
    %1 = vector.multi_reduction <add>, %0, %cst [0] : vector<8x100xf32> to vector<100xf32>
    %2 = vector.shape_cast %1 : vector<100xf32> to vector<1x100xf32>
    %cst_1 = arith.constant 8.000000e+00 : f32
    %3 = vector.broadcast %cst_1 : f32 to vector<1x100xf32>
    %4 = arith.divf %2, %3 : vector<1x100xf32>
    %5 = vector.broadcast %4 : vector<1x100xf32> to vector<8x100xf32>
    %6 = arith.subf %0, %5 : vector<8x100xf32>
    %7 = arith.mulf %6, %6 : vector<8x100xf32>
    %cst_2 = arith.constant dense<0.000000e+00> : vector<100xf32>
    %8 = vector.multi_reduction <add>, %7, %cst_2 [0] : vector<8x100xf32> to vector<100xf32>
    %9 = vector.shape_cast %8 : vector<100xf32> to vector<1x100xf32>
    %cst_3 = arith.constant 8.000000e+00 : f32
    %10 = vector.broadcast %cst_3 : f32 to vector<1x100xf32>
    %11 = arith.divf %9, %10 : vector<1x100xf32>
    %cst_4 = arith.constant 9.99999974E-6 : f32
    %12 = vector.broadcast %cst_4 : f32 to vector<1x100xf32>
    %13 = arith.addf %11, %12 : vector<1x100xf32>
    %14 = math.rsqrt %13 : vector<1x100xf32>
    %15 = vector.broadcast %14 : vector<1x100xf32> to vector<8x100xf32>
    %16 = arith.mulf %6, %15 : vector<8x100xf32>
    %c0_5 = arith.constant 0 : index
    %c0_6 = arith.constant 0 : index
    %17 = vector.load %arg1[%c0_5, %c0_6] : memref<8x100xf32, #tpu.memory_space<vmem>>, vector<8x100xf32>
    tpu.vector_store %arg1[%c0_5, %c0_6], %16 {strides = array<i32>} : memref<8x100xf32, #tpu.memory_space<vmem>>, vector<8x100xf32>,
    return
  }
}

</mosaic_0001>

<bundles_post_ra>
// kernel: tpu_custom_call.1
= control target key start
LH: loop header
LB: loop body
LE: loop exit
PB: predicated region body
PF: predicated region fallthrough
CT: control target
= control target key end

     0   :  { %6 = vsyncpa [#allocation3], 0  ;;  %s130_s0 = inlined_call_operand.hbm [shape: f32[8,100], index: 0, kind: input, shape index: {}, may-alias: {0,1}]   ;;  %s131_s1 = inlined_call_operand.hbm [shape: f32[8,100], index: 1, kind: output, shape index: {}, may-alias: {0,1}]  }
   0x1   :  { %7 = vsyncpa [#allocation4], 0  ;;  %s109_s6 = smov [#allocation2]  }
   0x2   :  { %s14_s7 = sshll.u32 %s109_s6, 4  ;;  %s15_s7 = int_to_ptr.vmem [resolvable:$true] %s14_s7 }
   0x3   :  { %s73_s8 = scalar_lea.vmem %s15_s7, 128  ;;  %p78_p1 = scmp.lt.s32.totalorder %s15_s7, %s15_s7 }
   0x4   :  { %p74_p0 = scmp.ne.s32.totalorder %s15_s7, %s73_s8  ;;  %p79_p2 = scmp.lt.s32.totalorder %s73_s8, %s73_s8 }
   0x6   :  { %p80_p3 = por %p79_p2, %p78_p1 }
   0x8   :  { %p81_p4 = pnand %p80_p3, %p74_p0 }
   0xa   :  { %84 = shalt.err (!%p81_p4)
}
   0xb   :  { %17 = dma.hbm_to_vmem [thread:$0]  %s130_s0, 128, %s15_s7, [#allocation3]  }
   0xc   :  { %105 = dma.done.wait [#allocation3], 128  }
   0xd   :  { %106 = vsyncadd [#allocation3], 4294967168  ;;  %vm22_vm0 = vcmask 818176   ;;  %v21_v0 = vld [vmem:[#allocation2] sm:$0xff]  ;;  %s110_s0 = smov [#allocation5]  }
   0xe   :  { %v23_v1 = vsel %vm22_vm0, %v21_v0, 0.0  ;;  %s52_s11 = sshll.u32 %s110_s0, 4  ;;  %s53_s11 = int_to_ptr.vmem [resolvable:$true] %s52_s11 }
   0xf   :  { %v24_v2 = vrot.slane %v23_v1, 4  ;;  %s85_s12 = scalar_lea.vmem %s53_s11, 128  ;;  %p90_p6 = scmp.lt.s32.totalorder %s53_s11, %s53_s11 }
  0x10   :  { %p86_p5 = scmp.ne.s32.totalorder %s53_s11, %s85_s12  ;;  %p91_p7 = scmp.lt.s32.totalorder %s85_s12, %s85_s12 }
  0x11   :  { %v25_v3 = vadd.f32 %v24_v2, %v23_v1 }
  0x12   :  { %p92_p8 = por %p91_p7, %p90_p6 }
  0x13   :  { %v26_v4 = vrot.slane %v25_v3, 2 }
  0x14   :  { %p93_p9 = pnand %p92_p8, %p86_p5 }
  0x15   :  { %v27_v5 = vadd.f32 %v26_v4, %v25_v3 }
  0x17   :  { %v28_v6 = vrot.slane %v27_v5, 1 }
  0x19   :  { %v29_v7 = vadd.f32 %v28_v6, %v27_v5 }
  0x1b   :  { %v31_v8 = vmul.f32 0.125, %v29_v7 }
  0x1d   :  { %v32_v9 = vsub.f32 %v21_v0, %v31_v8 }
  0x1f   :  { %v33_v10 = vmul.f32 %v32_v9, %v32_v9 }
  0x21   :  { %v34_v11 = vsel %vm22_vm0, %v33_v10, 0.0 }
  0x22   :  { %v35_v12 = vrot.slane %v34_v11, 4 }
  0x24   :  { %v36_v13 = vadd.f32 %v35_v12, %v34_v11 }
  0x26   :  { %v37_v14 = vrot.slane %v36_v13, 2 }
  0x28   :  { %v38_v15 = vadd.f32 %v37_v14, %v36_v13 }
  0x2a   :  { %v39_v16 = vrot.slane %v38_v15, 1 }
  0x2c   :  { %v40_v17 = vadd.f32 %v39_v16, %v38_v15 }
  0x2e   :  { %v41_v18 = vmul.f32 0.125, %v40_v17 }
  0x30   :  { %v42_v19 = vadd.f32 1e-05, %v41_v18 }
  0x32   :  { %63 = vrsqrt.f32 %v42_v19 }
  0x3f   :  { %v64_v20 = vpop.eup %63 }
  0x40   :  { %v44_v21 = vmul.f32 %v64_v20, %v32_v9 }
  0x42   :  { %45 = vst.msk [vmem:[#allocation5] sm:$0xff] %vm22_vm0, %v44_v21 }
  0x43   :  { %96 = shalt.err (!%p93_p9)
}
  0x44   :  { %55 = dma.vmem_to_hbm [thread:$0]  %s53_s11, 128, %s131_s1, [#allocation4]  }
  0x45   :  { %107 = dma.done.wait [#allocation4], 128  }
  0x46   :  { %108 = vsyncadd [#allocation4], 4294967168 }
  0x47   :  { %59 = vsyncpa [#allocation3], 1 }
  0x48   :  { %60 = vsyncpa [#allocation4], 1 }

</bundles_post_ra>
